<compile_context>
chip_gen: v6e
topology: v6e:2x2x1
jax: 0.10.0
libtpu: 0.0.40
codegen_flags: <defaults>
</compile_context>

<pallas_src>
import jax
import jax.numpy as jnp
from jax.experimental import pallas as pl
from jax.experimental.pallas import tpu as pltpu

NEG_SLOPE = 0.01   # nn.LeakyReLU default


def _leaky(v):
    return jnp.where(v > 0, v, NEG_SLOPE * v)


def _round_up(x, m):
    return (x + m - 1) // m * m


def conv_block_forward(x_nchw, params):
    """x_nchw: (N, Cin, H, W) float32. Returns (N, Cout, H, W) float32. strides=1 only."""
    W1, b1, W2, b2, W11, b11 = (params[k] for k in ("W1", "b1", "W2", "b2", "W11", "b11"))
    N, Cin, H, W = x_nchw.shape
    Cout = W1.shape[0]
    HW = H * W
    Cin_p = _round_up(Cin, 8)          # aligned tap blocks / packed contraction rows
    K1 = 9 * Cin_p
    K2 = 9 * Cout

    # ----------------------------- in-kernel helpers ---------------------------------

    def _tap_masks():
        # (1, HW) boolean validity mask per 3x3 tap (pad=1) in the flattened h*W+w lane layout.
        # None == tap valid everywhere (the centre tap).
        lane = jax.lax.broadcasted_iota(jnp.int32, (1, HW), 1)
        if W & (W - 1) == 0:
            ww = jnp.bitwise_and(lane, W - 1)        # column index (power-of-two fast path)
        else:
            ww = lane % W                            # not exercised in this script
        row_ok = (lane >= W, None, lane < (H - 1) * W)   # dy = 0, 1, 2
        col_ok = (ww >= 1, None, ww <= W - 2)            # dx = 0, 1, 2
        masks = []
        for dy in range(3):
            for dx in range(3):
                m, c = row_ok[dy], col_ok[dx]
                if m is None:
                    m = c
                elif c is not None:
                    m = jnp.logical_and(m, c)
                masks.append(m)
        return masks

    def _rotate_lanes(img, s):
        # img: (C, HW).  Returns t with t[:, l] = img[:, (l + s) % HW]  — a lane rotation
        # (the wrapped-in lanes are zeroed by the tap mask).  Written as slice+concat, which
        # Mosaic lowers to the same XLU lane-shift machinery as pltpu.roll.
        s = s % HW
        if s == 0:
            return img
        return jnp.concatenate([img[:, s:], img[:, :s]], axis=1)

    def _im2col_t(img, masks):
        # img: (C, HW) f32  ->  (9*C, HW) f32, rows ordered (tap, channel).  Each tap is a
        # shifted+masked copy of the whole image, so one K = 9*C matmul performs the 3x3 conv.
        taps = []
        k = 0
        for dy in range(3):
            for dx in range(3):
                t = _rotate_lanes(img, (dy - 1) * W + (dx - 1))
                if masks[k] is not None:
                    t = jnp.where(masks[k], t, 0.0)
                taps.append(t)
                k += 1
        return jnp.concatenate(taps, axis=0)

    def kernel(x_ref, w1c_ref, b1c_ref, w2_ref, b2_ref, o_ref):
        # x_ref  : (1, Cin_p, HW) f32   image in (channel, h*W+w) layout (zero-padded channels)
        # w1c_ref: (2*Cout, 9*Cin_p) bf16  fused [conv1 ; 1x1 shortcut] weights
        # b1c_ref: (2*Cout, 1) f32
        # w2_ref : (Cout, 9*Cout) bf16
        # b2_ref : (Cout, 1) f32
        # o_ref  : (1, Cout, HW) f32   flattened CHW output -> fully lane-dense stores
        masks = _tap_masks()

        # ---- conv #1 + 1x1 shortcut: single MXU push, K = 9*Cin_p ----
        xcol = _im2col_t(x_ref[0], masks).astype(jnp.bfloat16)            # (9*Cin_p, HW)
        r = jnp.dot(w1c_ref[...], xcol, preferred_element_type=jnp.float32)
        r = r + b1c_ref[...]                                              # (2*Cout, HW) f32
        y1 = _leaky(r[:Cout])                                             # conv1 + LeakyReLU
        sc = r[Cout:]                                                     # shortcut (no act.)

        # ---- conv #2: single MXU push, K = 9*Cout, im2col built in registers ----
        ycol = _im2col_t(y1, masks).astype(jnp.bfloat16)                  # (9*Cout, HW)
        y2 = jnp.dot(w2_ref[...], ycol, preferred_element_type=jnp.float32) + b2_ref[...]
        y2 = _leaky(y2)

        o_ref[0] = (y2 + sc).astype(o_ref.dtype)                          # dense (Cout, HW) store

    # ----------------------- wrapper-side operand preparation ------------------------

    # torch OIHW -> rows = Cout, cols = (dy, dx, ci) with ci zero-padded to Cin_p; bf16 operands.
    w1t = jnp.transpose(W1, (0, 2, 3, 1))                                 # (Cout, 3, 3, Cin)
    w1t = jnp.pad(w1t, ((0, 0), (0, 0), (0, 0), (0, Cin_p - Cin))).reshape(Cout, K1)
    # 1x1 shortcut embedded at the centre-tap (dy=dx=1) columns so it reuses the same im2col.
    wsc = (jnp.zeros((Cout, K1), jnp.float32)
           .at[:, 4 * Cin_p:4 * Cin_p + Cin].set(W11[:, :, 0, 0]))
    w1c = jnp.concatenate([w1t, wsc], axis=0).astype(jnp.bfloat16)        # (2*Cout, K1)
    b1c = jnp.concatenate([b1, b11], axis=0).reshape(2 * Cout, 1).astype(jnp.float32)

    w2t = jnp.transpose(W2, (0, 2, 3, 1)).reshape(Cout, K2).astype(jnp.bfloat16)
    b2t = b2.reshape(Cout, 1).astype(jnp.float32)

    # NCHW is already (channel, h*W+w)-major: flatten the spatial dims, pad channels to Cin_p.
    x_flat = jnp.pad(x_nchw.reshape(N, Cin, HW).astype(jnp.float32),
                     ((0, 0), (0, Cin_p - Cin), (0, 0)))

    flops = 2 * N * HW * (K1 * 2 * Cout + K2 * Cout)
    bytes_accessed = (x_flat.size * 4 + w1c.size * 2 + w2t.size * 2
                      + b1c.size * 4 + b2t.size * 4 + N * Cout * HW * 4)

    out = pl.pallas_call(
        kernel,
        out_shape=jax.ShapeDtypeStruct((N, Cout, HW), jnp.float32),
        grid_spec=pltpu.PrefetchScalarGridSpec(
            num_scalar_prefetch=0,
            grid=(N,),
            in_specs=[
                pl.BlockSpec((1, Cin_p, HW), lambda n: (n, 0, 0)),
                pl.BlockSpec((2 * Cout, K1), lambda n: (0, 0)),
                pl.BlockSpec((2 * Cout, 1), lambda n: (0, 0)),
                pl.BlockSpec((Cout, K2), lambda n: (0, 0)),
                pl.BlockSpec((Cout, 1), lambda n: (0, 0)),
            ],
            out_specs=pl.BlockSpec((1, Cout, HW), lambda n: (n, 0, 0)),
        ),
        compiler_params=pltpu.CompilerParams(dimension_semantics=("parallel",)),
        cost_estimate=pl.CostEstimate(flops=flops, transcendentals=0,
                                      bytes_accessed=bytes_accessed),
    )(x_flat, w1c, b1c, w2t, b2t)

    # (N, Cout, H*W) is already flattened NCHW.
    return out.reshape(N, Cout, H, W)


def conv_block_reference(x_nchw, params):
    """Pure-JAX f32 reference mirroring the PyTorch module (NCHW)."""
    def conv(x, w, b, pad):
        y = jax.lax.conv_general_dilated(
            x, w, window_strides=(1, 1), padding=((pad, pad), (pad, pad)),
            dimension_numbers=("NCHW", "OIHW", "NCHW"))
        return y + b[None, :, None, None]

    y = _leaky(conv(x_nchw, params["W1"], params["b1"], 1))
    y = _leaky(conv(y, params["W2"], params["b2"], 1))
    s = conv(x_nchw, params["W11"], params["b11"], 0)
    return y + s


def init_params(key, in_channel, out_channel):
    ks = jax.random.split(key, 6)
    scale = 0.1
    return {
        "W1": scale * jax.random.normal(ks[0], (out_channel, in_channel, 3, 3), jnp.float32),
        "b1": scale * jax.random.normal(ks[1], (out_channel,), jnp.float32),
        "W2": scale * jax.random.normal(ks[2], (out_channel, out_channel, 3, 3), jnp.float32),
        "b2": scale * jax.random.normal(ks[3], (out_channel,), jnp.float32),
        "W11": scale * jax.random.normal(ks[4], (out_channel, in_channel, 1, 1), jnp.float32),
        "b11": scale * jax.random.normal(ks[5], (out_channel,), jnp.float32),
    }


if __name__ == "__main__":
    key = jax.random.PRNGKey(0)
    k_x, k_p = jax.random.split(key)

    N, Cin, Cout, H, W = 2, 4, 8, 16, 16   # strides=1 (module default)
    x = jax.random.normal(k_x, (N, Cin, H, W), jnp.float32)
    params = init_params(k_p, Cin, Cout)

    out = conv_block_forward(x, params)
    out = jax.block_until_ready(out)

    ref = conv_block_reference(x, params)
    assert out.shape == ref.shape == (N, Cout, H, W)
    err = jnp.max(jnp.abs(out - ref))
    # bf16 MXU operands with f32 accumulation vs a pure-f32 reference.
    assert err < 5e-2, f"max abs err {err}"

    print("KERNEL_OK")
</pallas_src>

<mosaic_0001>
module attributes {stable_mosaic.version = 11 : i64} {
  func.func @kernel(%arg0: i32, %arg1: memref<1x8x256xf32, #tpu.memory_space<vmem>>, %arg2: memref<16x72xbf16, #tpu.memory_space<vmem>>, %arg3: memref<16x1xf32, #tpu.memory_space<vmem>>, %arg4: memref<8x72xbf16, #tpu.memory_space<vmem>>, %arg5: memref<8x1xf32, #tpu.memory_space<vmem>>, %arg6: memref<1x8x256xf32, #tpu.memory_space<vmem>>) attributes {dimension_semantics = [#tpu.dimension_semantics<parallel>], iteration_bounds = array<i64: 2>, scalar_prefetch = 0 : i64, scratch_operands = 0 : i64, tpu.core_type = #tpu.core_type<tc>, window_params = [{transform_indices = @transform_0, window_bounds = array<i64: 1, 8, 256>}, {pipeline_mode = #tpu.pipeline_mode<synchronous>, transform_indices = @transform_1, window_bounds = array<i64: 16, 72>}, {pipeline_mode = #tpu.pipeline_mode<synchronous>, transform_indices = @transform_2, window_bounds = array<i64: 16, 1>}, {pipeline_mode = #tpu.pipeline_mode<synchronous>, transform_indices = @transform_3, window_bounds = array<i64: 8, 72>}, {pipeline_mode = #tpu.pipeline_mode<synchronous>, transform_indices = @transform_4, window_bounds = array<i64: 8, 1>}, {transform_indices = @transform_5, window_bounds = array<i64: 1, 8, 256>}]} {
    %0 = tpu.iota {dimensions = array<i32: 1>} : vector<1x256xi32>
    %c15_i32 = arith.constant 15 : i32
    %1 = vector.broadcast %c15_i32 : i32 to vector<1x256xi32>
    %2 = arith.andi %0, %1 : vector<1x256xi32>
    %c16_i32 = arith.constant 16 : i32
    %3 = vector.broadcast %c16_i32 : i32 to vector<1x256xi32>
    %4 = arith.cmpi sge, %0, %3 : vector<1x256xi32>
    %c240_i32 = arith.constant 240 : i32
    %5 = vector.broadcast %c240_i32 : i32 to vector<1x256xi32>
    %6 = arith.cmpi slt, %0, %5 : vector<1x256xi32>
    %c1_i32 = arith.constant 1 : i32
    %7 = vector.broadcast %c1_i32 : i32 to vector<1x256xi32>
    %8 = arith.cmpi sge, %2, %7 : vector<1x256xi32>
    %c14_i32 = arith.constant 14 : i32
    %9 = vector.broadcast %c14_i32 : i32 to vector<1x256xi32>
    %10 = arith.cmpi sle, %2, %9 : vector<1x256xi32>
    %11 = arith.andi %4, %8 : vector<1x256xi1>
    %12 = arith.andi %4, %10 : vector<1x256xi1>
    %13 = arith.andi %6, %8 : vector<1x256xi1>
    %14 = arith.andi %6, %10 : vector<1x256xi1>
    %c0 = arith.constant 0 : index
    %c0_0 = arith.constant 0 : index
    %c0_1 = arith.constant 0 : index
    %15 = vector.load %arg1[%c0, %c0_0, %c0_1] : memref<1x8x256xf32, #tpu.memory_space<vmem>>, vector<1x8x256xf32>
    %16 = vector.shape_cast %15 : vector<1x8x256xf32> to vector<8x256xf32>
    %17 = vector.extract_strided_slice %16 {offsets = [0, 239], sizes = [8, 17], strides = [1, 1]} : vector<8x256xf32> to vector<8x17xf32>
    %18 = vector.extract_strided_slice %16 {offsets = [0, 0], sizes = [8, 239], strides = [1, 1]} : vector<8x256xf32> to vector<8x239xf32>
    %19 = tpu.concatenate %17, %18 in 1 : vector<8x17xf32>, vector<8x239xf32> -> vector<8x256xf32>
    %cst = arith.constant 0.000000e+00 : f32
    %20 = vector.shape_cast %11 : vector<1x256xi1> to vector<1x256xi1>
    %21 = vector.broadcast %20 : vector<1x256xi1> to vector<8x256xi1>
    %22 = vector.broadcast %cst : f32 to vector<8x256xf32>
    %23 = arith.select %21, %19, %22 : vector<8x256xi1>, vector<8x256xf32>
    %24 = vector.extract_strided_slice %16 {offsets = [0, 240], sizes = [8, 16], strides = [1, 1]} : vector<8x256xf32> to vector<8x16xf32>
    %25 = vector.extract_strided_slice %16 {offsets = [0, 0], sizes = [8, 240], strides = [1, 1]} : vector<8x256xf32> to vector<8x240xf32>
    %26 = tpu.concatenate %24, %25 in 1 : vector<8x16xf32>, vector<8x240xf32> -> vector<8x256xf32>
    %cst_2 = arith.constant 0.000000e+00 : f32
    %27 = vector.shape_cast %4 : vector<1x256xi1> to vector<1x256xi1>
    %28 = vector.broadcast %27 : vector<1x256xi1> to vector<8x256xi1>
    %29 = vector.broadcast %cst_2 : f32 to vector<8x256xf32>
    %30 = arith.select %28, %26, %29 : vector<8x256xi1>, vector<8x256xf32>
    %31 = vector.extract_strided_slice %16 {offsets = [0, 241], sizes = [8, 15], strides = [1, 1]} : vector<8x256xf32> to vector<8x15xf32>
    %32 = vector.extract_strided_slice %16 {offsets = [0, 0], sizes = [8, 241], strides = [1, 1]} : vector<8x256xf32> to vector<8x241xf32>
    %33 = tpu.concatenate %31, %32 in 1 : vector<8x15xf32>, vector<8x241xf32> -> vector<8x256xf32>
    %cst_3 = arith.constant 0.000000e+00 : f32
    %34 = vector.shape_cast %12 : vector<1x256xi1> to vector<1x256xi1>
    %35 = vector.broadcast %34 : vector<1x256xi1> to vector<8x256xi1>
    %36 = vector.broadcast %cst_3 : f32 to vector<8x256xf32>
    %37 = arith.select %35, %33, %36 : vector<8x256xi1>, vector<8x256xf32>
    %38 = vector.extract_strided_slice %16 {offsets = [0, 255], sizes = [8, 1], strides = [1, 1]} : vector<8x256xf32> to vector<8x1xf32>
    %39 = vector.extract_strided_slice %16 {offsets = [0, 0], sizes = [8, 255], strides = [1, 1]} : vector<8x256xf32> to vector<8x255xf32>
    %40 = tpu.concatenate %38, %39 in 1 : vector<8x1xf32>, vector<8x255xf32> -> vector<8x256xf32>
    %cst_4 = arith.constant 0.000000e+00 : f32
    %41 = vector.shape_cast %8 : vector<1x256xi1> to vector<1x256xi1>
    %42 = vector.broadcast %41 : vector<1x256xi1> to vector<8x256xi1>
    %43 = vector.broadcast %cst_4 : f32 to vector<8x256xf32>
    %44 = arith.select %42, %40, %43 : vector<8x256xi1>, vector<8x256xf32>
    %45 = vector.extract_strided_slice %16 {offsets = [0, 1], sizes = [8, 255], strides = [1, 1]} : vector<8x256xf32> to vector<8x255xf32>
    %46 = vector.extract_strided_slice %16 {offsets = [0, 0], sizes = [8, 1], strides = [1, 1]} : vector<8x256xf32> to vector<8x1xf32>
    %47 = tpu.concatenate %45, %46 in 1 : vector<8x255xf32>, vector<8x1xf32> -> vector<8x256xf32>
    %cst_5 = arith.constant 0.000000e+00 : f32
    %48 = vector.shape_cast %10 : vector<1x256xi1> to vector<1x256xi1>
    %49 = vector.broadcast %48 : vector<1x256xi1> to vector<8x256xi1>
    %50 = vector.broadcast %cst_5 : f32 to vector<8x256xf32>
    %51 = arith.select %49, %47, %50 : vector<8x256xi1>, vector<8x256xf32>
    %52 = vector.extract_strided_slice %16 {offsets = [0, 15], sizes = [8, 241], strides = [1, 1]} : vector<8x256xf32> to vector<8x241xf32>
    %53 = vector.extract_strided_slice %16 {offsets = [0, 0], sizes = [8, 15], strides = [1, 1]} : vector<8x256xf32> to vector<8x15xf32>
    %54 = tpu.concatenate %52, %53 in 1 : vector<8x241xf32>, vector<8x15xf32> -> vector<8x256xf32>
    %cst_6 = arith.constant 0.000000e+00 : f32
    %55 = vector.shape_cast %13 : vector<1x256xi1> to vector<1x256xi1>
    %56 = vector.broadcast %55 : vector<1x256xi1> to vector<8x256xi1>
    %57 = vector.broadcast %cst_6 : f32 to vector<8x256xf32>
    %58 = arith.select %56, %54, %57 : vector<8x256xi1>, vector<8x256xf32>
    %59 = vector.extract_strided_slice %16 {offsets = [0, 16], sizes = [8, 240], strides = [1, 1]} : vector<8x256xf32> to vector<8x240xf32>
    %60 = vector.extract_strided_slice %16 {offsets = [0, 0], sizes = [8, 16], strides = [1, 1]} : vector<8x256xf32> to vector<8x16xf32>
    %61 = tpu.concatenate %59, %60 in 1 : vector<8x240xf32>, vector<8x16xf32> -> vector<8x256xf32>
    %cst_7 = arith.constant 0.000000e+00 : f32
    %62 = vector.shape_cast %6 : vector<1x256xi1> to vector<1x256xi1>
    %63 = vector.broadcast %62 : vector<1x256xi1> to vector<8x256xi1>
    %64 = vector.broadcast %cst_7 : f32 to vector<8x256xf32>
    %65 = arith.select %63, %61, %64 : vector<8x256xi1>, vector<8x256xf32>
    %66 = vector.extract_strided_slice %16 {offsets = [0, 17], sizes = [8, 239], strides = [1, 1]} : vector<8x256xf32> to vector<8x239xf32>
    %67 = vector.extract_strided_slice %16 {offsets = [0, 0], sizes = [8, 17], strides = [1, 1]} : vector<8x256xf32> to vector<8x17xf32>
    %68 = tpu.concatenate %66, %67 in 1 : vector<8x239xf32>, vector<8x17xf32> -> vector<8x256xf32>
    %cst_8 = arith.constant 0.000000e+00 : f32
    %69 = vector.shape_cast %14 : vector<1x256xi1> to vector<1x256xi1>
    %70 = vector.broadcast %69 : vector<1x256xi1> to vector<8x256xi1>
    %71 = vector.broadcast %cst_8 : f32 to vector<8x256xf32>
    %72 = arith.select %70, %68, %71 : vector<8x256xi1>, vector<8x256xf32>
    %73 = tpu.concatenate %23, %30, %37, %44, %16, %51, %58, %65, %72 in 0 : vector<8x256xf32>, vector<8x256xf32>, vector<8x256xf32>, vector<8x256xf32>, vector<8x256xf32>, vector<8x256xf32>, vector<8x256xf32>, vector<8x256xf32>, vector<8x256xf32> -> vector<72x256xf32>
    %74 = arith.truncf %73 : vector<72x256xf32> to vector<72x256xbf16>
    %c0_9 = arith.constant 0 : index
    %c0_10 = arith.constant 0 : index
    %75 = vector.load %arg2[%c0_9, %c0_10] : memref<16x72xbf16, #tpu.memory_space<vmem>>, vector<16x72xbf16>
    %cst_11 = arith.constant dense<0.000000e+00> : vector<16x256xf32>
    %76 = tpu.matmul %75, %74, %cst_11 {dimension_numbers = #tpu.dot_dimension_numbers<[1], [0], [0], [1], [0, 0, 1, 1], [], []>} : vector<16x72xbf16>, vector<72x256xbf16>, vector<16x256xf32> -> vector<16x256xf32>
    %c0_12 = arith.constant 0 : index
    %c0_13 = arith.constant 0 : index
    %77 = vector.load %arg3[%c0_12, %c0_13] : memref<16x1xf32, #tpu.memory_space<vmem>>, vector<16x1xf32>
    %78 = vector.broadcast %77 : vector<16x1xf32> to vector<16x256xf32>
    %79 = arith.addf %76, %78 : vector<16x256xf32>
    %80 = vector.extract_strided_slice %79 {offsets = [0, 0], sizes = [8, 256], strides = [1, 1]} : vector<16x256xf32> to vector<8x256xf32>
    %cst_14 = arith.constant 0.000000e+00 : f32
    %81 = vector.broadcast %cst_14 : f32 to vector<8x256xf32>
    %82 = arith.cmpf ogt, %80, %81 : vector<8x256xf32>
    %cst_15 = arith.constant 0.00999999977 : f32
    %83 = vector.broadcast %cst_15 : f32 to vector<8x256xf32>
    %84 = arith.mulf %83, %80 : vector<8x256xf32>
    %85 = arith.select %82, %80, %84 : vector<8x256xi1>, vector<8x256xf32>
    %86 = vector.extract_strided_slice %79 {offsets = [8, 0], sizes = [8, 256], strides = [1, 1]} : vector<16x256xf32> to vector<8x256xf32>
    %87 = vector.extract_strided_slice %85 {offsets = [0, 239], sizes = [8, 17], strides = [1, 1]} : vector<8x256xf32> to vector<8x17xf32>
    %88 = vector.extract_strided_slice %85 {offsets = [0, 0], sizes = [8, 239], strides = [1, 1]} : vector<8x256xf32> to vector<8x239xf32>
    %89 = tpu.concatenate %87, %88 in 1 : vector<8x17xf32>, vector<8x239xf32> -> vector<8x256xf32>
    %cst_16 = arith.constant 0.000000e+00 : f32
    %90 = vector.shape_cast %11 : vector<1x256xi1> to vector<1x256xi1>
    %91 = vector.broadcast %90 : vector<1x256xi1> to vector<8x256xi1>
    %92 = vector.broadcast %cst_16 : f32 to vector<8x256xf32>
    %93 = arith.select %91, %89, %92 : vector<8x256xi1>, vector<8x256xf32>
    %94 = vector.extract_strided_slice %85 {offsets = [0, 240], sizes = [8, 16], strides = [1, 1]} : vector<8x256xf32> to vector<8x16xf32>
    %95 = vector.extract_strided_slice %85 {offsets = [0, 0], sizes = [8, 240], strides = [1, 1]} : vector<8x256xf32> to vector<8x240xf32>
    %96 = tpu.concatenate %94, %95 in 1 : vector<8x16xf32>, vector<8x240xf32> -> vector<8x256xf32>
    %cst_17 = arith.constant 0.000000e+00 : f32
    %97 = vector.shape_cast %4 : vector<1x256xi1> to vector<1x256xi1>
    %98 = vector.broadcast %97 : vector<1x256xi1> to vector<8x256xi1>
    %99 = vector.broadcast %cst_17 : f32 to vector<8x256xf32>
    %100 = arith.select %98, %96, %99 : vector<8x256xi1>, vector<8x256xf32>
    %101 = vector.extract_strided_slice %85 {offsets = [0, 241], sizes = [8, 15], strides = [1, 1]} : vector<8x256xf32> to vector<8x15xf32>
    %102 = vector.extract_strided_slice %85 {offsets = [0, 0], sizes = [8, 241], strides = [1, 1]} : vector<8x256xf32> to vector<8x241xf32>
    %103 = tpu.concatenate %101, %102 in 1 : vector<8x15xf32>, vector<8x241xf32> -> vector<8x256xf32>
    %cst_18 = arith.constant 0.000000e+00 : f32
    %104 = vector.shape_cast %12 : vector<1x256xi1> to vector<1x256xi1>
    %105 = vector.broadcast %104 : vector<1x256xi1> to vector<8x256xi1>
    %106 = vector.broadcast %cst_18 : f32 to vector<8x256xf32>
    %107 = arith.select %105, %103, %106 : vector<8x256xi1>, vector<8x256xf32>
    %108 = vector.extract_strided_slice %85 {offsets = [0, 255], sizes = [8, 1], strides = [1, 1]} : vector<8x256xf32> to vector<8x1xf32>
    %109 = vector.extract_strided_slice %85 {offsets = [0, 0], sizes = [8, 255], strides = [1, 1]} : vector<8x256xf32> to vector<8x255xf32>
    %110 = tpu.concatenate %108, %109 in 1 : vector<8x1xf32>, vector<8x255xf32> -> vector<8x256xf32>
    %cst_19 = arith.constant 0.000000e+00 : f32
    %111 = vector.shape_cast %8 : vector<1x256xi1> to vector<1x256xi1>
    %112 = vector.broadcast %111 : vector<1x256xi1> to vector<8x256xi1>
    %113 = vector.broadcast %cst_19 : f32 to vector<8x256xf32>
    %114 = arith.select %112, %110, %113 : vector<8x256xi1>, vector<8x256xf32>
    %115 = vector.extract_strided_slice %85 {offsets = [0, 1], sizes = [8, 255], strides = [1, 1]} : vector<8x256xf32> to vector<8x255xf32>
    %116 = vector.extract_strided_slice %85 {offsets = [0, 0], sizes = [8, 1], strides = [1, 1]} : vector<8x256xf32> to vector<8x1xf32>
    %117 = tpu.concatenate %115, %116 in 1 : vector<8x255xf32>, vector<8x1xf32> -> vector<8x256xf32>
    %cst_20 = arith.constant 0.000000e+00 : f32
    %118 = vector.shape_cast %10 : vector<1x256xi1> to vector<1x256xi1>
    %119 = vector.broadcast %118 : vector<1x256xi1> to vector<8x256xi1>
    %120 = vector.broadcast %cst_20 : f32 to vector<8x256xf32>
    %121 = arith.select %119, %117, %120 : vector<8x256xi1>, vector<8x256xf32>
    %122 = vector.extract_strided_slice %85 {offsets = [0, 15], sizes = [8, 241], strides = [1, 1]} : vector<8x256xf32> to vector<8x241xf32>
    %123 = vector.extract_strided_slice %85 {offsets = [0, 0], sizes = [8, 15], strides = [1, 1]} : vector<8x256xf32> to vector<8x15xf32>
    %124 = tpu.concatenate %122, %123 in 1 : vector<8x241xf32>, vector<8x15xf32> -> vector<8x256xf32>
    %cst_21 = arith.constant 0.000000e+00 : f32
    %125 = vector.shape_cast %13 : vector<1x256xi1> to vector<1x256xi1>
    %126 = vector.broadcast %125 : vector<1x256xi1> to vector<8x256xi1>
    %127 = vector.broadcast %cst_21 : f32 to vector<8x256xf32>
    %128 = arith.select %126, %124, %127 : vector<8x256xi1>, vector<8x256xf32>
    %129 = vector.extract_strided_slice %85 {offsets = [0, 16], sizes = [8, 240], strides = [1, 1]} : vector<8x256xf32> to vector<8x240xf32>
    %130 = vector.extract_strided_slice %85 {offsets = [0, 0], sizes = [8, 16], strides = [1, 1]} : vector<8x256xf32> to vector<8x16xf32>
    %131 = tpu.concatenate %129, %130 in 1 : vector<8x240xf32>, vector<8x16xf32> -> vector<8x256xf32>
    %cst_22 = arith.constant 0.000000e+00 : f32
    %132 = vector.shape_cast %6 : vector<1x256xi1> to vector<1x256xi1>
    %133 = vector.broadcast %132 : vector<1x256xi1> to vector<8x256xi1>
    %134 = vector.broadcast %cst_22 : f32 to vector<8x256xf32>
    %135 = arith.select %133, %131, %134 : vector<8x256xi1>, vector<8x256xf32>
    %136 = vector.extract_strided_slice %85 {offsets = [0, 17], sizes = [8, 239], strides = [1, 1]} : vector<8x256xf32> to vector<8x239xf32>
    %137 = vector.extract_strided_slice %85 {offsets = [0, 0], sizes = [8, 17], strides = [1, 1]} : vector<8x256xf32> to vector<8x17xf32>
    %138 = tpu.concatenate %136, %137 in 1 : vector<8x239xf32>, vector<8x17xf32> -> vector<8x256xf32>
    %cst_23 = arith.constant 0.000000e+00 : f32
    %139 = vector.shape_cast %14 : vector<1x256xi1> to vector<1x256xi1>
    %140 = vector.broadcast %139 : vector<1x256xi1> to vector<8x256xi1>
    %141 = vector.broadcast %cst_23 : f32 to vector<8x256xf32>
    %142 = arith.select %140, %138, %141 : vector<8x256xi1>, vector<8x256xf32>
    %143 = tpu.concatenate %93, %100, %107, %114, %85, %121, %128, %135, %142 in 0 : vector<8x256xf32>, vector<8x256xf32>, vector<8x256xf32>, vector<8x256xf32>, vector<8x256xf32>, vector<8x256xf32>, vector<8x256xf32>, vector<8x256xf32>, vector<8x256xf32> -> vector<72x256xf32>
    %144 = arith.truncf %143 : vector<72x256xf32> to vector<72x256xbf16>
    %c0_24 = arith.constant 0 : index
    %c0_25 = arith.constant 0 : index
    %145 = vector.load %arg4[%c0_24, %c0_25] : memref<8x72xbf16, #tpu.memory_space<vmem>>, vector<8x72xbf16>
    %cst_26 = arith.constant dense<0.000000e+00> : vector<8x256xf32>
    %146 = tpu.matmul %145, %144, %cst_26 {dimension_numbers = #tpu.dot_dimension_numbers<[1], [0], [0], [1], [0, 0, 1, 1], [], []>} : vector<8x72xbf16>, vector<72x256xbf16>, vector<8x256xf32> -> vector<8x256xf32>
    %c0_27 = arith.constant 0 : index
    %c0_28 = arith.constant 0 : index
    %147 = vector.load %arg5[%c0_27, %c0_28] : memref<8x1xf32, #tpu.memory_space<vmem>>, vector<8x1xf32>
    %148 = vector.broadcast %147 : vector<8x1xf32> to vector<8x256xf32>
    %149 = arith.addf %146, %148 : vector<8x256xf32>
    %cst_29 = arith.constant 0.000000e+00 : f32
    %150 = vector.broadcast %cst_29 : f32 to vector<8x256xf32>
    %151 = arith.cmpf ogt, %149, %150 : vector<8x256xf32>
    %cst_30 = arith.constant 0.00999999977 : f32
    %152 = vector.broadcast %cst_30 : f32 to vector<8x256xf32>
    %153 = arith.mulf %152, %149 : vector<8x256xf32>
    %154 = arith.select %151, %149, %153 : vector<8x256xi1>, vector<8x256xf32>
    %155 = arith.addf %154, %86 : vector<8x256xf32>
    %c0_31 = arith.constant 0 : index
    %c0_32 = arith.constant 0 : index
    %c0_33 = arith.constant 0 : index
    %156 = vector.load %arg6[%c0_31, %c0_32, %c0_33] : memref<1x8x256xf32, #tpu.memory_space<vmem>>, vector<1x8x256xf32>
    %157 = vector.shape_cast %156 : vector<1x8x256xf32> to vector<8x256xf32>
    %158 = vector.shape_cast %155 : vector<8x256xf32> to vector<1x8x256xf32>
    tpu.vector_store %arg6[%c0_31, %c0_32, %c0_33], %158 {strides = array<i32>} : memref<1x8x256xf32, #tpu.memory_space<vmem>>, vector<1x8x256xf32>,
    return
  }
  func.func @transform_0(%arg0: i32) -> (i32, i32, i32) {
    %c0_i32 = arith.constant 0 : i32
    %c0_i32_0 = arith.constant 0 : i32
    %c0_i32_1 = arith.constant 0 : i32
    return %arg0, %c0_i32, %c0_i32_0 : i32, i32, i32
  }
  func.func @transform_1(%arg0: i32) -> (i32, i32) {
    %c0_i32 = arith.constant 0 : i32
    %c0_i32_0 = arith.constant 0 : i32
    %c0_i32_1 = arith.constant 0 : i32
    return %c0_i32, %c0_i32_0 : i32, i32
  }
  func.func @transform_2(%arg0: i32) -> (i32, i32) {
    %c0_i32 = arith.constant 0 : i32
    %c0_i32_0 = arith.constant 0 : i32
    %c0_i32_1 = arith.constant 0 : i32
    return %c0_i32, %c0_i32_0 : i32, i32
  }
  func.func @transform_3(%arg0: i32) -> (i32, i32) {
    %c0_i32 = arith.constant 0 : i32
    %c0_i32_0 = arith.constant 0 : i32
    %c0_i32_1 = arith.constant 0 : i32
    return %c0_i32, %c0_i32_0 : i32, i32
  }
  func.func @transform_4(%arg0: i32) -> (i32, i32) {
    %c0_i32 = arith.constant 0 : i32
    %c0_i32_0 = arith.constant 0 : i32
    %c0_i32_1 = arith.constant 0 : i32
    return %c0_i32, %c0_i32_0 : i32, i32
  }
  func.func @transform_5(%arg0: i32) -> (i32, i32, i32) {
    %c0_i32 = arith.constant 0 : i32
    %c0_i32_0 = arith.constant 0 : i32
    %c0_i32_1 = arith.constant 0 : i32
    return %arg0, %c0_i32, %c0_i32_0 : i32, i32, i32
  }
}

</mosaic_0001>

<bundles_post_ra>
// kernel: tpu_custom_call.1
= control target key start
LH: loop header
LB: loop body
LE: loop exit
PB: predicated region body
PF: predicated region fallthrough
CT: control target
= control target key end

     0   :  { %10 = vsyncpa [#allocation3], 0  ;;  %s1451_s0 = inlined_call_operand.hbm [shape: f32[2,8,256], index: 0, kind: input, shape index: {}]   ;;  %s1452_s1 = inlined_call_operand.vmem [shape: bf16[16,72], index: 1, kind: input, shape index: {}]   ;;  %s1453_s2 = inlined_call_operand.vmem [shape: f32[16,1], index: 2, kind: input, shape index: {}]   ;;  %s1454_s3 = inlined_call_operand.vmem [shape: bf16[8,72], index: 3, kind: input, shape index: {}]   ;;  %s1455_s4 = inlined_call_operand.vmem [shape: f32[8,1], index: 4, kind: input, shape index: {}]   ;;  %s1456_s5 = inlined_call_operand.hbm [shape: f32[2,8,256], index: 5, kind: output, shape index: {}]  }
   0x1   :  { %12 = vsyncpa [#allocation3 + $0x1], 0 }
   0x2   :  { %13 = vsyncpa [#allocation4], 0 }
   0x3   :  { %15 = vsyncpa [#allocation4 + $0x1], 0  ;;  %s1080_s18 = smov 0   ;;  %s1082_s19 = smov 0  }
   0x4   :  { %s1084_s20 = smov 0   ;;  %s1086_s21 = smov 0  }
   0x5 LB: > { %s1101_s22 = sadd.s32 4294967295, %s1036_s21   ;;  %s736_s23 = sadd.s32 4294967294, %s1036_s21   ;;  %s1036_s21 = sphi %s1086_s21, %s1535_s21   ;;  %s1032_s20 = sphi %s1084_s20, %s1534_s20   ;;  %s1028_s19 = sphi %s1082_s19, %s1533_s19   ;;  %s1024_s18 = sphi %s1080_s18, %s1532_s18  }
   0x6   : > { %s1105_s24 = sadd.s32 1, %s1036_s21   ;;  %s28_s25 = sadd.s32 1, %s1032_s20 }
   0x7   : > { %s25_s26 = ssub.s32 %s1036_s21, %s1105_s24  ;;  %p35_p0 = scmp.ne.s32.totalorder %s1032_s20, %s1028_s19 }
   0x8   : > { %p26_p1 = scmp.eq.s32.totalorder %s25_s26, 0  ;;  %p36_p2 = scmp.eq.s32.totalorder %s1036_s21, 0 }
   0x9   : > { %p41_p3 = scmp.ne.s32.totalorder %s1028_s19, %s1024_s18  ;;  %p42_p4 = scmp.eq.s32.totalorder %s1101_s22, 0 }
   0xa   : > { %s1117_s27 = scalar_select %p26_p1, %s1032_s20, %s28_s25  }
   0xb   : > { %p1119_p5 = por %p36_p2, %p35_p0  ;;  %p1123_p6 = por %p42_p4, %p41_p3 }
   0xc   : > { %p149_p7 = scmp.eq.s32.totalorder %s1101_s22, 1  ;;  %p155_p8 = scmp.eq.s32.totalorder %s736_s23, 1 }
   0xd   : > { %s1473_s29 = scalar_select %p1123_p6, 1, 0 }
   0xe   : > { %p817_p10 = scmp.lt.s32.totalorder %s1036_s21, 2  ;;  %p1130_p11 = por %p149_p7, %p35_p0 }
   0xf   : > { %p1134_p12 = por %p155_p8, %p41_p3  ;;  %s187_s7 = sand.u32 1, %s1032_s20  }
  0x10   : > { %s1474_s30 = scalar_select %p1130_p11, 1, 0 }
  0x11   : > { %s1475_s6 = scalar_select %p1134_p12, 1, 0 }
  0x12   : > { %s803_s8 = sshll.u32 %s1036_s21, 8  ;;  %s739_s9 = sshll.u32 %s187_s7, 4 }
  0x13   : > { %s1143_s12 = scalar_lea.hbm %s1451_s0, %s803_s8  ;;  %s191_s13 = scalar_lea.vmem [#allocation2], %s739_s9 }
  0x14   : > { %s199_s14 = sshll.u32 %s191_s13, 4  ;;  %p1147_p13 = pnand %p817_p10, %p1119_p5  ;;  %s1151_s14 = int_to_ptr.vmem [resolvable:$true] %s199_s14 }
  0x15   : > { %s188_s16 = scalar_lea.sflag [#allocation3], %s187_s7  ;;  %s944_s17 = scalar_lea.hbm %s1143_s12, 256 }
  0x16   : > { %p945_p2 = scmp.ne.s32.totalorder %s1143_s12, %s944_s17  ;;  %p946_p3 = pneg %p1147_p13 }
  0x17   : > { %s949_s26 = scalar_lea.hbm %s1451_s0, 512  ;;  %p950_p5 = scmp.lt.s32.totalorder %s1143_s12, %s1451_s0 }
  0x18   : > { %p947_p4 = pnand %p946_p3, %p945_p2  ;;  %p951_p8 = scmp.lt.s32.totalorder %s949_s26, %s944_s17 }
  0x1a   : > { %p948_p7 = pneg %p947_p4  ;;  %p952_p10 = por %p951_p8, %p950_p5 }
  0x1c   : > { %p953_p9 = pnand %p952_p10, %p948_p7 }
  0x1e   : > { %956 = shalt.err (!%p953_p9)
}
  0x1f   : > { %s957_s7 = scalar_lea.vmem %s1151_s14, 256  ;;  %s1038_s9 = smov [#allocation2]  }
  0x20   : > { %p958_p0 = scmp.ne.s32.totalorder %s1151_s14, %s957_s7  ;;  %s962_s10 = sshll.u32 %s1038_s9, 4  ;;  %s963_s10 = int_to_ptr.vmem [resolvable:$false] %s962_s10 }
  0x21   : > { %s964_s11 = scalar_lea.vmem %s963_s10, 512  ;;  %p965_p4 = scmp.lt.s32.totalorder %s1151_s14, %s963_s10 }
  0x22   : > { %p960_p1 = pnand %p958_p0, %p946_p3  ;;  %p966_p12 = scmp.lt.s32.totalorder %s964_s11, %s957_s7 }
  0x24   : > { %p961_p2 = pneg %p960_p1  ;;  %p967_p11 = por %p966_p12, %p965_p4 }
  0x26   : > { %p968_p6 = pnand %p967_p11, %p961_p2 }
  0x28   : > { %971 = shalt.err (!%p968_p6)
}
  0x29   : > { %812 = dma.hbm_to_vmem [thread:$0]  (!%p1147_p13), %s1143_s12, 256, %s1151_s14, %s188_s16  }
  0x2a   : > { %p1477_p9 = scmp.lt.s32.totalorder %s1036_s21, 3  ;;  %p1478_p7 = scmp.ge.s32.totalorder %s1036_s21, 1 }
  0x2c   : > { %p205_p0 = pnand %p1478_p7, %p1477_p9 }
  0x2d   : > { %s1178_s13 = sand.u32 (!%p205_p0), 1, %s1028_s19   ;;  %p1479_p6 = scmp.ne.s32.totalorder (!%p205_p0), %s1473_s29, 0 }
  0x2e   : > { %208 = sbr.rel (%p205_p0) target bundleno = 754 (0x2f2), region = 40  ;;  %s743_s17 = sshll.u32 (!%p205_p0), %s1178_s13, 4 }
  0x2f   : > { %s211_s23 = scalar_lea.sflag (!%p205_p0), [#allocation3], %s1178_s13  ;;  %s214_s15 = scalar_lea.vmem (!%p205_p0), [#allocation2], %s743_s17 }
  0x33   : > { %1015 = dma.done.wait (%p1479_p6), %s211_s23, 256  }
  0x34   : > { %1017 = vsyncadd (%p1479_p6), %s211_s23, 4294967040  ;;  %v1188_v0 = vld [vmem:[%s214_s15] sm:$0xff]  ;;  %v1190_v1 = vld [vmem:[%s214_s15 + $0x8] sm:$0xff]  ;;  %s1039_s12 = smov 111   ;;  %s1040_s14 = smov 112   ;;  %v1045_v4 = vmov 0   ;;  %v242_v6 = vlaneseq }
  0x35   : > { %v861_v2 = vpack.i.bf16 %v1190_v1, %v1188_v0  ;;  %s1041_s16 = smov 113   ;;  %s1042_s25 = smov 127   ;;  %v886_v3 = vpack.i.bf16 %v1188_v0, %v1190_v1  ;;  %467 = vmatprep.mubr.bf16.mxu0 %v1045_v4  ;;  %901 = vset.pattern.permute.xlu0 %v1045_v4  ;;  %v407_v5 = vld [vmem:[%s1453_s2] sm:$0xff]  ;;  %vm1462_vm2 = vcmask 916480   ;;  %vm1465_vm3 = vcmask 908288  }
  0x36   : > { %s1043_s29 = smov 1   ;;  %s1044_s26 = smov 15   ;;  %942 = vset.pattern.permute.xlu1 %v1045_v4  ;;  %632 = vmatprep.mubr.bf16.mxu1 %v1045_v4  ;;  %v1207_v7 = vand.u32 127, %v242_v6  ;;  %vm1461_vm7 = vcmask 924672   ;;  %vm1460_vm8 = vcmask 1043456   ;;  %vm1459_vm9 = vcmask 1039360  }
  0x37   : > { %862 = vrot.lane.b32.xlu0 %v861_v2, %s1039_s12  ;;  %872 = vrot.lane.b32.xlu1 %v861_v2, %s1040_s14  ;;  %s1046_s28 = smov 16   ;;  %s1047_s8 = smov 17   ;;  %vm1463_vm13 = vcmask 7168   ;;  %vm1464_vm14 = vcmask 121856   ;;  %vm1048_vm15 = vmmov 1  }
  0x38   : > { %v244_v8 = vadd.s32 128, %v1207_v7  ;;  %v245_v10 = vand.u32 15, %v1207_v7  ;;  %v584_v57 = vld [vmem:[%s1454_s3] sm:$0xf]  ;;  %s652_s10 = scalar_lea.sflag [#allocation4], %s1178_s13  ;;  %p1529_p12 = scmp.ne.s32.totalorder %s1474_s30, 0 }
  0x3a   : > { %v246_v9 = vand.u32 15, %v244_v8  ;;  %vm250_vm0 = vcmp.lt.s32.totalorder %v244_v8, 240  ;;  %vm1215_vm4 = vcmp.le.s32.totalorder %v245_v10, 14  ;;  %vm1241_vm11 = vcmp.ge.s32.totalorder %v245_v10, 1 }
  0x3b   : > { %867 = vrot.lane.b32.xlu0 %v861_v2, %s1041_s16  ;;  %877 = vrot.lane.b32.xlu1 %v861_v2, %s1042_s25 }
  0x3c   : > { %vm1211_vm1 = vcmp.le.s32.totalorder %v246_v9, 14  ;;  %vm1219_vm5 = vcmp.ge.s32.totalorder %v246_v9, 1 }
  0x3d   : > { %vm1226_vm6 = vmand %vm250_vm0, %vm1211_vm1 }
  0x3e   : > { %vm260_vm10 = vmand %vm250_vm0, %vm1219_vm5 }
  0x3f   : > { %887 = vrot.lane.b32.xlu1 %v886_v3, %s1043_s29  ;;  %882 = vrot.lane.b32.xlu0 %v886_v3, %s1044_s26  ;;  %vm1250_vm12 = vmpackc.low %vm250_vm0, %vm260_vm10 }
  0x40   : > { %vm1260_vm0 = vmpackc.low %vm1048_vm15, %vm1241_vm11 }
  0x41   : > { %vm1269_vm10 = vmpackc.low %vm1211_vm1, %vm1048_vm15 }
  0x43   : > { %897 = vrot.lane.b32.xlu1 %v886_v3, %s1046_s28  ;;  %892 = vrot.lane.b32.xlu0 %v886_v3, %s1047_s8 }
  0x47   : > { %411 = vperm.xlu0 %901, %v407_v5  }
  0xa9   : > { %v863_v12 = vpop.permute.xlu0 %862  ;;  %v873_v13 = vpop.permute.xlu1 %872 }
  0xaa   : > { %v865_v16 = vunpack.i.h.bf16 %v863_v12  ;;  %v864_v17 = vunpack.i.l.bf16 %v863_v12  ;;  %v875_v18 = vunpack.i.h.bf16 %v873_v13  ;;  %v874_v19 = vunpack.i.l.bf16 %v873_v13 }
  0xab   : > { %v1505_v13 = vmov 0 }
  0xac   : > { %v388_v21 = vsel %vm1465_vm3, %v865_v16, %v864_v17  ;;  %v384_v22 = vsel %vm1465_vm3, %v864_v17, %v865_v16  ;;  %v368_v23 = vsel %vm1462_vm2, %v874_v19, %v875_v18  ;;  %v372_v24 = vsel %vm1462_vm2, %v875_v18, %v874_v19  ;;  %v943_v16 = vld [vmem:[%s1452_s1] sm:$0xff]  }
  0xad   : > { %v868_v25 = vpop.permute.xlu0 %867  ;;  %v394_v26 = vsel %vm1226_vm6, %v388_v21, 0.0  ;;  %v393_v27 = vsel %vm1215_vm4, %v384_v22, 0.0  ;;  %v878_v28 = vpop.permute.xlu1 %877  ;;  %vm1468_vm2 = vcmask 138240  }
  0xae   : > { %v870_v29 = vunpack.i.h.bf16 %v868_v25  ;;  %v869_v30 = vunpack.i.l.bf16 %v868_v25  ;;  %v404_v31 = vpack.c.bf16 %v394_v26, %v394_v26  ;;  %v403_v32 = vpack.c.bf16 %v393_v27, %v393_v27 }
  0xaf   : > { %v880_v33 = vunpack.i.h.bf16 %v878_v28  ;;  %v879_v34 = vunpack.i.l.bf16 %v878_v28  ;;  %v585_v28 = vld [vmem:[%s1455_s4] sm:$0xff] }
  0xb0   : > { %v352_v36 = vsel %vm1461_vm7, %v869_v30, %v870_v29  ;;  %v356_v37 = vsel %vm1461_vm7, %v870_v29, %v869_v30  ;;  %746 = vmatprep.subr.msk.bf16.mxu0 %vm1460_vm8, %v404_v31  ;;  %v430_v38 = vsel %vm1460_vm8, %v403_v32, 0  ;;  %vm1467_vm8 = vcmask 130048   ;;  %vm1283_vm7 = vmpackc.low %vm1215_vm4, %vm1048_vm15  ;;  %v408_v29 = vld [vmem:[%s1453_s2 + $0x8] sm:$0xff] }
  0xb1   : > { %v748_v40 = vpack.c.bf16 %v372_v24, %v356_v37  ;;  %v751_v41 = vpack.c.bf16 %v368_v23, %v352_v36  ;;  %442 = vmatpush1.bf16.msra.mxu0 %v430_v38  ;;  %v340_v42 = vsel %vm1459_vm9, %v880_v33, %v879_v34  ;;  %v888_v43 = vpop.permute.xlu1 %887  ;;  %v883_v44 = vpop.permute.xlu0 %882  ;;  %v336_v45 = vsel %vm1459_vm9, %v879_v34, %v880_v33 }
  0xb2   : > { %v754_v46 = vpack.c.bf16 %v340_v42, %v1190_v1  ;;  %v890_v48 = vunpack.i.h.bf16 %v888_v43  ;;  %v889_v49 = vunpack.i.l.bf16 %v888_v43  ;;  %v885_v50 = vunpack.i.h.bf16 %v883_v44 }
  0xb3   : > { %749 = vmatprep.subr.msk.bf16.mxu0 %vm1250_vm12, %v748_v40  ;;  %v884_v51 = vunpack.i.l.bf16 %v883_v44  ;;  %vm1466_vm9 = vcmp.ge.s32.totalorder %v1207_v7, 16  ;;  %v757_v54 = vpack.c.bf16 %v336_v45, %v1188_v0 }
  0xb4   : > { %v321_v53 = vsel %vm1463_vm13, %v890_v48, %v889_v49  ;;  %v324_v55 = vsel %vm1463_vm13, %v889_v49, %v890_v48  ;;  %vm1294_vm13 = vmand %vm1466_vm9, %vm1215_vm4 }
  0xb5   : > { %752 = vmatpush1.bf16.msk.msra.mxu0 %vm1260_vm0, %v751_v41  ;;  %v305_v56 = vsel %vm1464_vm14, %v885_v50, %v884_v51  ;;  %v898_v58 = vpop.permute.xlu1 %897  ;;  %v893_v59 = vpop.permute.xlu0 %892  ;;  %v308_v60 = vsel %vm1464_vm14, %v884_v51, %v885_v50  ;;  %vm1469_vm14 = vmpackc.low %vm1219_vm5, %vm1211_vm1 }
  0xb6   : > { %v760_v61 = vpack.c.bf16 %v321_v53, %v305_v56  ;;  %755 = vmatprep.subr.msk.bf16.mxu0 %vm1269_vm10, %v754_v46  ;;  %v900_v62 = vunpack.i.h.bf16 %v898_v58  ;;  %v899_v63 = vunpack.i.l.bf16 %v898_v58  ;;  %v895_v1 = vunpack.i.h.bf16 %v893_v59  ;;  %vm1320_vm9 = vmpackc.low %vm1048_vm15, %vm1219_vm5 }
  0xb7   : > { %v894_v2 = vunpack.i.l.bf16 %v893_v59  ;;  %v763_v4 = vpack.c.bf16 %v324_v55, %v308_v60 }
  0xb8   : > { %v289_v3 = vsel %vm1467_vm8, %v900_v62, %v899_v63  ;;  %v292_v6 = vsel %vm1467_vm8, %v899_v63, %v900_v62  ;;  %vm1502_vm8 = vcmp.ge.s32.totalorder %v1207_v7, 16 }
  0xb9   : > { %758 = vmatpush1.bf16.msk.msra.mxu0 %vm1283_vm7, %v757_v54  ;;  %v273_v5 = vsel %vm1468_vm2, %v895_v1, %v894_v2  ;;  %v276_v8 = vsel %vm1468_vm2, %v894_v2, %v895_v1  ;;  %vm255_vm3 = vmand %vm1502_vm8, %vm1241_vm11 }
  0xba   : > { %v766_v9 = vpack.c.bf16 %v289_v3, %v273_v5  ;;  %761 = vmatprep.subr.msk.bf16.mxu0 %vm1469_vm14, %v760_v61  ;;  %v769_v12 = vpack.c.bf16 %v292_v6, %v276_v8  ;;  %vm1503_vm2 = vmpackc.low %vm1241_vm11, %vm1294_vm13 }
  0xbb   : > { %vm1504_vm15 = vmmov %vm1502_vm8  ;;  %vm1470_vm8 = vcmask 588800  }
  0xbc   : > { %vm1337_vm14 = vmpackc.low %vm1504_vm15, %vm255_vm3  ;;  %vm1507_vm15 = vcmask 908288  }
  0xbd   : > { %764 = vmatpush1.bf16.msk.msra.mxu0 %vm1503_vm2, %v763_v4  ;;  %v1506_v13 = vsel %vm1337_vm14, 4294967295, %v1505_v13 }
  0xbe   : > { %767 = vmatprep.subr.msk.bf16.mxu0 %vm1320_vm9, %v766_v9 }
  0xc1   : > { %770 = vmatpush1.bf16.msk.msra.mxu0 %vm1337_vm14, %v769_v12 }
  0xc2   : > { %v412_v17 = vpop.permute.xlu0 %411 }
  0xc4   : > { %771 = vmatmul.mubr.msk.bf16.vlgmr.msra.gmra.mxu0 %vm1470_vm8, %v943_v16  ;;  %vm1510_vm8 = vcmask 924672  }
  0xc5   : > { %vm1511_vm14 = vmmov %vm1510_vm8 }
 0x184   : > { %v469_v18 = vpop.f32.mrf.mxu0 }
 0x185   : > { %v470_v19 = vadd.f32 %v469_v18, %v412_v17 }
 0x186   : > { %v471_v21 = vpop.f32.mrf.mxu0 }
 0x187   : > { %v480_v22 = vmul.f32 0.01, %v470_v19  ;;  %v472_v7 = vadd.f32 %v471_v21, %v412_v17  ;;  %vm478_vm2 = vcmp.gt.f32.partialorder %v470_v19, 0.0 }
 0x189   : > { %vm479_vm3 = vcmp.gt.f32.partialorder %v472_v7, 0.0  ;;  %v481_v23 = vmul.f32 0.01, %v472_v7  ;;  %v1347_v24 = vsel %vm478_vm2, %v470_v19, %v480_v22  ;;  %vm1508_vm2 = vmmov %vm1507_vm15 }
 0x18b   : > { %v483_v25 = vsel %vm479_vm3, %v472_v7, %v481_v23  ;;  %vm1509_vm3 = vcmask 916480  }
 0x18c   : > { %v912_v26 = vpack.i.bf16 %v483_v25, %v1347_v24  ;;  %v922_v27 = vpack.i.bf16 %v1347_v24, %v483_v25 }
 0x18e   : > { %913 = vrot.lane.b32.xlu0 %v912_v26, %s1040_s14  ;;  %903 = vrot.lane.b32.xlu1 %v912_v26, %s1039_s12 }
 0x192   : > { %923 = vrot.lane.b32.xlu0 %v922_v27, %s1044_s26  ;;  %908 = vrot.lane.b32.xlu1 %v912_v26, %s1041_s16  ;;  %s240_s26 = scalar_lea.vmem [#allocation5], %s743_s17 }
 0x196   : > { %933 = vrot.lane.b32.xlu0 %v922_v27, %s1047_s8  ;;  %918 = vrot.lane.b32.xlu1 %v912_v26, %s1042_s25 }
 0x19a   : > { %588 = vperm.xlu0 %901, %v585_v28   ;;  %928 = vrot.lane.b32.xlu1 %v922_v27, %s1043_s29  ;;  %s804_s29 = sshll.u32 %s1101_s22, 8  ;;  %s1049_s22 = smov [#allocation5]  }
 0x19b   : > { %s664_s9 = scalar_lea.hbm %s1456_s5, %s804_s29  ;;  %s976_s17 = sshll.u32 %s1049_s22, 4  ;;  %s977_s17 = int_to_ptr.vmem [resolvable:$false] %s976_s17 }
 0x19c   : > { %s978_s23 = scalar_lea.vmem %s977_s17, 512 }
 0x19e   : > { %938 = vrot.lane.b32.xlu1 %v922_v27, %s1046_s28  ;;  %s666_s28 = sshll.u32 %s240_s26, 4  ;;  %s667_s28 = int_to_ptr.vmem [resolvable:$true] %s666_s28 }
 0x19f   : > { %s972_s11 = scalar_lea.vmem %s667_s28, 256  ;;  %p979_p3 = scmp.lt.s32.totalorder %s667_s28, %s977_s17 }
 0x1a0   : > { %p973_p11 = scmp.ne.s32.totalorder %s667_s28, %s972_s11  ;;  %p980_p5 = scmp.lt.s32.totalorder %s978_s23, %s972_s11 }
 0x1a2   : > { %416 = vperm.xlu1 %942, %v408_v29   ;;  %p974_p13 = pnand %p973_p11, %p1529_p12  ;;  %p981_p8 = por %p980_p5, %p979_p3 }
 0x1a4   : > { %p975_p1 = pneg %p974_p13 }
 0x1a6   : > { %p982_p10 = pnand %p981_p8, %p975_p1 }
 0x200   : > { %v914_v30 = vpop.permute.xlu0 %913  ;;  %v904_v31 = vpop.permute.xlu1 %903 }
 0x201   : > { %v906_v32 = vunpack.i.h.bf16 %v904_v31  ;;  %v905_v33 = vunpack.i.l.bf16 %v904_v31  ;;  %v916_v34 = vunpack.i.h.bf16 %v914_v30  ;;  %v915_v36 = vunpack.i.l.bf16 %v914_v30 }
 0x203   : > { %v571_v37 = vsel %vm1507_vm15, %v906_v32, %v905_v33  ;;  %v567_v38 = vsel %vm1508_vm2, %v905_v33, %v906_v32  ;;  %v560_v49 = vsel %vm1509_vm3, %v916_v34, %v915_v36  ;;  %vm1512_vm15 = vcmask 1043456  }
 0x204   : > { %v909_v40 = vpop.permute.xlu1 %908  ;;  %v573_v41 = vsel %vm1226_vm6, %v571_v37, 0.0  ;;  %v572_v42 = vsel %vm1215_vm4, %v567_v38, 0.0  ;;  %v924_v45 = vpop.permute.xlu0 %923  ;;  %vm1513_vm2 = vmmov %vm1512_vm15  ;;  %vm1515_vm6 = vcmask 1039360  }
 0x205   : > { %v911_v43 = vunpack.i.h.bf16 %v909_v40  ;;  %v910_v44 = vunpack.i.l.bf16 %v909_v40  ;;  %v583_v46 = vpack.c.bf16 %v573_v41, %v573_v41  ;;  %v582_v48 = vpack.c.bf16 %v572_v42, %v572_v42  ;;  %vm1514_vm4 = vmmov %vm1509_vm3 }
 0x206   : > { %v556_v56 = vsel %vm1514_vm4, %v915_v36, %v916_v34  ;;  %v926_v58 = vunpack.i.h.bf16 %v924_v45  ;;  %v925_v59 = vunpack.i.l.bf16 %v924_v45 }
 0x207   : > { %v549_v50 = vsel %vm1510_vm8, %v911_v43, %v910_v44  ;;  %v545_v51 = vsel %vm1511_vm14, %v910_v44, %v911_v43  ;;  %772 = vmatprep.subr.msk.bf16.mxu1 %vm1512_vm15, %v583_v46  ;;  %v595_v20 = vsel %vm1513_vm2, %v582_v48, 0  ;;  %vm1516_vm14 = vmmov %vm1515_vm6  ;;  %vm1517_vm8 = vcmask 121856  }
 0x208   : > { %v774_v53 = vpack.c.bf16 %v560_v49, %v549_v50  ;;  %v919_v54 = vpop.permute.xlu1 %918  ;;  %607 = vmatpush1.bf16.msra.mxu1 %v595_v20  ;;  %v777_v60 = vpack.c.bf16 %v556_v56, %v545_v51  ;;  %v934_v62 = vpop.permute.xlu0 %933  ;;  %v513_v5 = vsel %vm1517_vm8, %v926_v58, %v925_v59  ;;  %vm1522_vm15 = vcmask 138240  }
 0x209   : > { %v921_v55 = vunpack.i.h.bf16 %v919_v54  ;;  %v920_v14 = vunpack.i.l.bf16 %v919_v54  ;;  %v936_v39 = vunpack.i.h.bf16 %v934_v62  ;;  %v935_v6 = vunpack.i.l.bf16 %v934_v62 }
 0x20a   : > { %775 = vmatprep.subr.msk.bf16.mxu1 %vm1250_vm12, %v774_v53  ;;  %vm1518_vm12 = vcmask 7168   ;;  %vm1523_vm2 = vcmask 130048  }
 0x20b   : > { %v538_v61 = vsel %vm1515_vm6, %v921_v55, %v920_v14  ;;  %v534_v63 = vsel %vm1516_vm14, %v920_v14, %v921_v55  ;;  %vm1519_vm3 = vmmov %vm1518_vm12  ;;  %v491_v52 = vsel %vm1522_vm15, %v936_v39, %v935_v6 }
 0x20c   : > { %v780_v1 = vpack.c.bf16 %v538_v61, %v483_v25  ;;  %v929_v2 = vpop.permute.xlu1 %928  ;;  %778 = vmatpush1.bf16.msk.msra.mxu1 %vm1260_vm0, %v777_v60  ;;  %v783_v8 = vpack.c.bf16 %v534_v63, %v1347_v24  ;;  %vm1520_vm0 = vmmov %vm1517_vm8  ;;  %v473_v24 = vpop.f32.mrf.mxu0 }
 0x20d   : > { %v931_v3 = vunpack.i.h.bf16 %v929_v2  ;;  %v930_v4 = vunpack.i.l.bf16 %v929_v2  ;;  %v516_v47 = vsel %vm1520_vm0, %v925_v59, %v926_v58  ;;  %vm1524_vm4 = vmmov %vm1523_vm2 }
 0x20e   : > { %781 = vmatprep.subr.msk.bf16.mxu1 %vm1269_vm10, %v780_v1  ;;  %vm1521_vm10 = vmpackc.low %vm1219_vm5, %vm1211_vm1  ;;  %vm1527_vm1 = vnez %v1506_v13  ;;  %vm1528_vm5 = vcmask 588800   ;;  %v475_v30 = vpop.f32.mrf.mxu0 }
 0x20f   : > { %v524_v9 = vsel %vm1518_vm12, %v931_v3, %v930_v4  ;;  %v527_v12 = vsel %vm1519_vm3, %v930_v4, %v931_v3  ;;  %vm1526_vm6 = vmmov %vm1522_vm15 }
 0x210   : > { %v786_v16 = vpack.c.bf16 %v524_v9, %v513_v5  ;;  %v939_v17 = vpop.permute.xlu1 %938  ;;  %784 = vmatpush1.bf16.msk.msra.mxu1 %vm1283_vm7, %v783_v8  ;;  %v789_v21 = vpack.c.bf16 %v527_v12, %v516_v47  ;;  %vm1525_vm7 = vmpackc.low %vm1241_vm11, %vm1294_vm13  ;;  %v494_v15 = vsel %vm1526_vm6, %v935_v6, %v936_v39 }
 0x211   : > { %v941_v18 = vunpack.i.h.bf16 %v939_v17  ;;  %v940_v19 = vunpack.i.l.bf16 %v939_v17 }
 0x212   : > { %787 = vmatprep.subr.msk.bf16.mxu1 %vm1521_vm10, %v786_v16 }
 0x213   : > { %v502_v22 = vsel %vm1523_vm2, %v941_v18, %v940_v19  ;;  %v505_v7 = vsel %vm1524_vm4, %v940_v19, %v941_v18 }
 0x214   : > { %v792_v23 = vpack.c.bf16 %v502_v22, %v491_v52  ;;  %790 = vmatpush1.bf16.msk.msra.mxu1 %vm1525_vm7, %v789_v21  ;;  %v795_v11 = vpack.c.bf16 %v505_v7, %v494_v15 }
 0x215   : > { %v589_v35 = vpop.permute.xlu0 %588 }
 0x216   : > { %793 = vmatprep.subr.msk.bf16.mxu1 %vm1320_vm9, %v792_v23 }
 0x218   : > { %796 = vmatpush1.bf16.msk.msra.mxu1 %vm1527_vm1, %v795_v11 }
 0x21b   : > { %797 = vmatmul.mubr.msk.bf16.vlgmr.msra.gmra.mxu1 %vm1528_vm5, %v584_v57 }
 0x21d   : > { %v417_v25 = vpop.permute.xlu1 %416 }
 0x21e   : > { %v474_v29 = vadd.f32 %v473_v24, %v417_v25  ;;  %v476_v33 = vadd.f32 %v475_v30, %v417_v25 }
 0x2db   : > { %v634_v0 = vpop.f32.mrf.mxu1 }
 0x2dc   : > { %v635_v26 = vadd.f32 %v634_v0, %v589_v35 }
 0x2dd   : > { %v636_v27 = vpop.f32.mrf.mxu1 }
 0x2de   : > { %vm641_vm11 = vcmp.gt.f32.partialorder %v635_v26, 0.0  ;;  %v643_v10 = vmul.f32 0.01, %v635_v26  ;;  %v637_v28 = vadd.f32 %v636_v27, %v589_v35 }
 0x2df   : > { %v638_v13 = vpop.f32.mrf.mxu1 }
 0x2e0   : > { %v645_v31 = vsel %vm641_vm11, %v635_v26, %v643_v10  ;;  %vm642_vm9 = vcmp.gt.f32.partialorder %v637_v28, 0.0  ;;  %v644_v32 = vmul.f32 0.01, %v637_v28 }
 0x2e1   : > { %v647_v34 = vadd.f32 %v645_v31, %v474_v29  ;;  %v639_v36 = vpop.f32.mrf.mxu1 }
 0x2e2   : > { %v646_v37 = vsel %vm642_vm9, %v637_v28, %v644_v32 }
 0x2e3   : > { %v648_v38 = vadd.f32 %v646_v37, %v476_v33  ;;  %649 = vst [vmem:[%s240_s26] sm:$0xff] %v647_v34 }
 0x2e5   : > { %650 = vst [vmem:[%s240_s26 + $0x8] sm:$0xff] %v648_v38 }
 0x2e6   : > { %985 = shalt.err (!%p982_p10)
}
 0x2e7   : > { %s986_s15 = scalar_lea.hbm %s664_s9, 256  ;;  %s990_s14 = scalar_lea.hbm %s1456_s5, 512 }
 0x2e8   : > { %p987_p2 = scmp.ne.s32.totalorder %s664_s9, %s986_s15  ;;  %p991_p7 = scmp.lt.s32.totalorder %s664_s9, %s1456_s5 }
 0x2e9   : > { %p992_p0 = scmp.lt.s32.totalorder %s990_s14, %s986_s15 }
 0x2ea   : > { %p988_p4 = pnand %p987_p2, %p1529_p12 }
 0x2eb   : > { %p993_p6 = por %p992_p0, %p991_p7 }
 0x2ec   : > { %p989_p9 = pneg %p988_p4 }
 0x2ee   : > { %p994_p11 = pnand %p993_p6, %p989_p9 }
 0x2f0   : > { %997 = shalt.err (!%p994_p11)
}
 0x2f1   : > { %807 = dma.vmem_to_hbm [thread:$0]  (%p1529_p12), %s667_s28, 256, %s664_s9, %s652_s10  }
 0x2f2 PF: > { %s678_s29 = sand.u32 1, %s1024_s18   ;;  %p1530_p13 = scmp.ne.s32.totalorder %s1475_s6, 0 }
 0x2f3   : > { %p1531_p1 = scmp.ge.s32.totalorder %s1036_s21, 2  ;;  %s679_s26 = scalar_lea.sflag [#allocation4], %s678_s29 }
 0x2f5   : > { %p814_p3 = pnand %p1531_p1, %p1530_p13 }
 0x2f7   : > { %p815_p5 = pneg %p814_p3 }
 0x2f9   : > { %1019 = dma.done.wait (%p815_p5), %s679_s26, 256  }
 0x2fa   : > { %1021 = vsyncadd (%p815_p5), %s679_s26, 4294967040  ;;  %p18_p8 = scmp.ge.s32.totalorder %s1105_s24, 4   ;;  %s1532_s18 = smov %s1028_s19 }
 0x2fb   : > { %s1533_s19 = smov %s1032_s20  ;;  %s1534_s20 = smov %s1117_s27 }
 0x2fc   : > { %s1535_s21 = smov %s1105_s24  ;;  %20 = sbr.rel (!%p18_p8) target bundleno = 5 (0x5), region = 85 }
 0x301   :  { %684 = vsyncpa [#allocation3], 1 }
 0x302   :  { %686 = vsyncpa [#allocation3 + $0x1], 1 }
 0x303   :  { %687 = vsyncpa [#allocation4], 1 }
 0x304   :  { %689 = vsyncpa [#allocation4 + $0x1], 1 }

</bundles_post_ra>
